<compile_context>
chip_gen: v6e
topology: v6e:2x2x1
jax: 0.10.0
libtpu: 0.0.40
codegen_flags: <defaults>
</compile_context>

<pallas_src>
import math

import jax
import jax.numpy as jnp
from jax import lax
from jax.experimental import pallas as pl
from jax.experimental.pallas import tpu as pltpu


def _make_kernel(cf, hw, tk, need_mask):
    """Kernel closure over static sizes (cf, hw, tk) and the padded-key mask flag."""

    def kernel(q_ref, k_ref, v_ref, out_ref, m_sc, acc_sc):
        kv = pl.program_id(2)

        @pl.when(kv == 0)
        def _init():
            m_sc[...] = jnp.full_like(m_sc, -jnp.inf)
            acc_sc[...] = jnp.zeros_like(acc_sc)

        # scores in (TK, TQ): contract the channel axis of the bf16 K/Q tiles with
        # f32 accumulation (native MXU rate, no explicit transpose).
        s = lax.dot_general(k_ref[0], q_ref[0],
                            dimension_numbers=(((0,), (0,)), ((), ())),
                            preferred_element_type=jnp.float32)        # (TK, TQ)

        if need_mask:
            # Only traced when hw was padded: mask out-of-range keys.
            idx = lax.broadcasted_iota(jnp.int32, (tk, 1), 0) + kv * tk
            s = jnp.where(idx < hw, s, -jnp.inf)

        # online softmax over the kv (sublane) axis
        m_prev = m_sc[...]                                              # (1, TQ)
        m_new = jnp.maximum(m_prev, jnp.max(s, axis=0, keepdims=True))  # (1, TQ)
        alpha = jnp.exp(m_prev - m_new)                                 # (1, TQ)
        p = jnp.exp(s - m_new).astype(jnp.bfloat16)                     # (TK, TQ)

        # Single PV matmul: rows 0..cf-1 accumulate p@flow, the last (ones) row
        # accumulates sum(p) — the softmax denominator folded into the MXU op.
        pv = jnp.dot(v_ref[0], p, preferred_element_type=jnp.float32)   # (cf+1, TQ)
        acc_sc[...] = alpha * acc_sc[...] + pv
        m_sc[...] = m_new

        @pl.when(kv == pl.num_programs(2) - 1)
        def _finish():
            acc = acc_sc[...]
            l = acc[cf:cf + 1, :]
            inv = pl.reciprocal(l, approx=True)      # EUP vrcp
            inv = inv * (2.0 - l * inv)              # one Newton step -> f32 accuracy
            out_ref[0] = (acc[:cf, :] * inv).astype(out_ref.dtype)

    return kernel


def _pick_tiles(hw_pad):
    tq = 128
    for t in (2048, 1024, 512, 256):
        if hw_pad % t == 0:
            tq = t
            break
    tk = 128
    for t in (512, 256):
        if hw_pad % t == 0:
            tk = t
            break
    return tq, tk


def feature_flow_attention(feature0_nchw, flow_nchw, wq, bq, wk, bk, *, tq=None, tk=None):
    """feature0_nchw: (b, c, h, w), flow_nchw: (b, cf, h, w) -> (b, cf, h, w)."""
    b, c, h, w = feature0_nchw.shape
    cf = flow_nchw.shape[1]
    hw = h * w

    # Pad the flattened spatial axis to a lane-aligned multiple of 128 so flash
    # tiling never degenerates to a single full-extent (hw, hw) block.
    hw_pad = ((hw + 127) // 128) * 128
    d_tq, d_tk = _pick_tiles(hw_pad)
    if tq is None:
        tq = d_tq
        # keep >= 2 parallel grid units so dual-TC chips (v7x) both get work
        while b * (hw_pad // tq) < 2 and tq > 128:
            tq //= 2
    if tk is None:
        tk = d_tk
    assert hw_pad % tq == 0 and hw_pad % tk == 0, "tile sizes must divide padded h*w"

    f32 = jnp.float32
    bf16 = jnp.bfloat16
    scale = 1.0 / math.sqrt(c)

    feat = feature0_nchw.reshape(b, c, hw).astype(f32)   # channel-major, free reshape
    flow = flow_nchw.reshape(b, cf, hw).astype(f32)

    # Parameter folding (tiny, once): 1/sqrt(c) into the Q projection; the serial
    # k_proj(q_proj(x)) fused into a single affine (Wqk = Wk@Wq, bqk = Wk@bq + bk).
    wq_s = wq.astype(f32) * scale
    bq_s = bq.astype(f32) * scale
    wqk = jnp.dot(wk.astype(f32), wq.astype(f32), preferred_element_type=f32)
    bqk = jnp.dot(wk.astype(f32), bq.astype(f32), preferred_element_type=f32) + bk.astype(f32)

    # Hoisted projections: one batched XLA matmul each, then bf16 for the in-kernel
    # MXU scores matmul (and half the HBM bytes for the re-read K stream).
    q = (jnp.einsum('oc,bcn->bon', wq_s, feat) + bq_s[None, :, None]).astype(bf16)
    k = (jnp.einsum('oc,bcn->bon', wqk, feat) + bqk[None, :, None]).astype(bf16)

    # Value augmented with a ones-row (softmax denominator via the PV matmul).
    v_aug = jnp.concatenate([flow, jnp.ones((b, 1, hw), f32)], axis=1).astype(bf16)

    pad = hw_pad - hw
    if pad:
        q = jnp.pad(q, ((0, 0), (0, 0), (0, pad)))
        k = jnp.pad(k, ((0, 0), (0, 0), (0, pad)))
        v_aug = jnp.pad(v_aug, ((0, 0), (0, 0), (0, pad)))

    grid = (b, hw_pad // tq, hw_pad // tk)
    kernel = _make_kernel(cf, hw, tk, need_mask=bool(pad))

    out = pl.pallas_call(
        kernel,
        out_shape=jax.ShapeDtypeStruct((b, cf, hw_pad), feature0_nchw.dtype),
        grid_spec=pltpu.PrefetchScalarGridSpec(
            num_scalar_prefetch=0,
            grid=grid,
            in_specs=[
                pl.BlockSpec((1, c, tq), lambda bi, qi, ki: (bi, 0, qi)),       # Q tile (bf16)
                pl.BlockSpec((1, c, tk), lambda bi, qi, ki: (bi, 0, ki)),       # K tile (bf16)
                pl.BlockSpec((1, cf + 1, tk), lambda bi, qi, ki: (bi, 0, ki)),  # [flow; 1] tile
            ],
            out_specs=pl.BlockSpec((1, cf, tq), lambda bi, qi, ki: (bi, 0, qi)),
            scratch_shapes=[
                pltpu.VMEM((1, tq), jnp.float32),        # running max
                pltpu.VMEM((cf + 1, tq), jnp.float32),   # [acc; denom] accumulator
            ],
        ),
        compiler_params=pltpu.CompilerParams(
            dimension_semantics=("parallel", "parallel", "arbitrary"),
            vmem_limit_bytes=32 * 1024 * 1024),
    )(q, k, v_aug)

    if pad:
        out = out[:, :, :hw]
    # (b, cf, hw) -> (b, cf, h, w): pure reshape, free.
    return out.reshape(b, cf, h, w)


def _reference(feature0_nchw, flow_nchw, wq, bq, wk, bk):
    b, c, h, w = feature0_nchw.shape
    cf = flow_nchw.shape[1]
    hw = h * w
    x = jnp.transpose(feature0_nchw.reshape(b, c, hw), (0, 2, 1)).astype(jnp.float32)
    v = jnp.transpose(flow_nchw.reshape(b, cf, hw), (0, 2, 1)).astype(jnp.float32)
    q = x @ wq.T + bq
    k = q @ wk.T + bk
    scores = jnp.einsum("bnc,bmc->bnm", q, k) / math.sqrt(c)
    prob = jax.nn.softmax(scores, axis=-1)
    out = jnp.einsum("bnm,bmf->bnf", prob, v)
    return jnp.transpose(out.reshape(b, h, w, cf), (0, 3, 1, 2))


if __name__ == "__main__":
    key = jax.random.PRNGKey(0)
    b, c, h, w = 2, 16, 16, 16
    cf = 2  # flow channels

    k1, k2, k3, k4 = jax.random.split(key, 4)
    feature0 = jax.random.normal(k1, (b, c, h, w), dtype=jnp.float32)
    flow = jax.random.normal(k2, (b, cf, h, w), dtype=jnp.float32)

    # Deterministic parameter init (xavier-uniform-like scale for weights, zero bias).
    bound = math.sqrt(6.0 / (c + c))
    wq = jax.random.uniform(k3, (c, c), minval=-bound, maxval=bound, dtype=jnp.float32)
    wk = jax.random.uniform(k4, (c, c), minval=-bound, maxval=bound, dtype=jnp.float32)
    bq = jnp.zeros((c,), dtype=jnp.float32)
    bk = jnp.zeros((c,), dtype=jnp.float32)

    # tq=tk=128 so the toy run (hw=256) exercises the multi-tile online-softmax path
    # (grid 2x2x2); real resolutions use the larger defaults from _pick_tiles.
    out = feature_flow_attention(feature0, flow, wq, bq, wk, bk, tq=128, tk=128)
    out = jax.block_until_ready(out)

    ref = jax.block_until_ready(_reference(feature0, flow, wq, bq, wk, bk))
    assert out.shape == (b, cf, h, w)
    # bf16 MXU operands (f32 accumulation): flash-attention-standard tolerance.
    assert jnp.allclose(out, ref, atol=1e-2, rtol=1e-2), "mismatch vs reference"

    # TODO(synk): forward_local_window_attn (F.unfold-based local window attention) not
    # implemented; only the default global-attention forward path is covered.
    print("KERNEL_OK")
</pallas_src>

<mosaic_0001>
module attributes {stable_mosaic.version = 11 : i64} {
  func.func @kernel(%arg0: i32, %arg1: i32, %arg2: i32, %arg3: memref<1x16x128xbf16, #tpu.memory_space<vmem>>, %arg4: memref<1x16x128xbf16, #tpu.memory_space<vmem>>, %arg5: memref<1x3x128xbf16, #tpu.memory_space<vmem>>, %arg6: memref<1x2x128xf32, #tpu.memory_space<vmem>>, %arg7: memref<1x128xf32, #tpu.memory_space<vmem>>, %arg8: memref<3x128xf32, #tpu.memory_space<vmem>>) attributes {dimension_semantics = [#tpu.dimension_semantics<parallel>, #tpu.dimension_semantics<parallel>, #tpu.dimension_semantics<arbitrary>], iteration_bounds = array<i64: 2, 2, 2>, scalar_prefetch = 0 : i64, scratch_operands = 2 : i64, tpu.core_type = #tpu.core_type<tc>, window_params = [{transform_indices = @transform_0, window_bounds = array<i64: 1, 16, 128>}, {transform_indices = @transform_1, window_bounds = array<i64: 1, 16, 128>}, {transform_indices = @transform_2, window_bounds = array<i64: 1, 3, 128>}, {transform_indices = @transform_3, window_bounds = array<i64: 1, 2, 128>}]} {
    %c0_i32 = arith.constant 0 : i32
    %0 = arith.cmpi eq, %arg2, %c0_i32 : i32
    %1 = arith.extui %0 : i1 to i32
    %c0_i32_0 = arith.constant 0 : i32
    %2 = arith.cmpi ne, %1, %c0_i32_0 : i32
    scf.if %2 {
      %cst_20 = arith.constant 0xFF800000 : f32
      %30 = vector.broadcast %cst_20 : f32 to vector<1x128xf32>
      %c0_21 = arith.constant 0 : index
      %c0_22 = arith.constant 0 : index
      %31 = vector.load %arg7[%c0_21, %c0_22] : memref<1x128xf32, #tpu.memory_space<vmem>>, vector<1x128xf32>
      tpu.vector_store %arg7[%c0_21, %c0_22], %30 {strides = array<i32>} : memref<1x128xf32, #tpu.memory_space<vmem>>, vector<1x128xf32>,
      %cst_23 = arith.constant 0.000000e+00 : f32
      %32 = vector.broadcast %cst_23 : f32 to vector<3x128xf32>
      %c0_24 = arith.constant 0 : index
      %c0_25 = arith.constant 0 : index
      %33 = vector.load %arg8[%c0_24, %c0_25] : memref<3x128xf32, #tpu.memory_space<vmem>>, vector<3x128xf32>
      tpu.vector_store %arg8[%c0_24, %c0_25], %32 {strides = array<i32>} : memref<3x128xf32, #tpu.memory_space<vmem>>, vector<3x128xf32>,
    } else {
    }
    %c0 = arith.constant 0 : index
    %c0_1 = arith.constant 0 : index
    %c0_2 = arith.constant 0 : index
    %3 = vector.load %arg4[%c0, %c0_1, %c0_2] : memref<1x16x128xbf16, #tpu.memory_space<vmem>>, vector<1x16x128xbf16>
    %4 = vector.shape_cast %3 : vector<1x16x128xbf16> to vector<16x128xbf16>
    %c0_3 = arith.constant 0 : index
    %c0_4 = arith.constant 0 : index
    %c0_5 = arith.constant 0 : index
    %5 = vector.load %arg3[%c0_3, %c0_4, %c0_5] : memref<1x16x128xbf16, #tpu.memory_space<vmem>>, vector<1x16x128xbf16>
    %6 = vector.shape_cast %5 : vector<1x16x128xbf16> to vector<16x128xbf16>
    %cst = arith.constant dense<0.000000e+00> : vector<128x128xf32>
    %7 = tpu.matmul %4, %6, %cst {dimension_numbers = #tpu.dot_dimension_numbers<[0], [0], [1], [1], [0, 1, 1, 1], [], []>} : vector<16x128xbf16>, vector<16x128xbf16>, vector<128x128xf32> -> vector<128x128xf32>
    %c0_6 = arith.constant 0 : index
    %c0_7 = arith.constant 0 : index
    %8 = vector.load %arg7[%c0_6, %c0_7] : memref<1x128xf32, #tpu.memory_space<vmem>>, vector<1x128xf32>
    %cst_8 = arith.constant dense<0xFF800000> : vector<128xf32>
    %9 = vector.multi_reduction <maximumf>, %7, %cst_8 [0] : vector<128x128xf32> to vector<128xf32>
    %10 = vector.shape_cast %9 : vector<128xf32> to vector<1x128xf32>
    %11 = arith.maximumf %8, %10 : vector<1x128xf32>
    %12 = arith.subf %8, %11 : vector<1x128xf32>
    %13 = math.exp %12 : vector<1x128xf32>
    %14 = vector.broadcast %11 : vector<1x128xf32> to vector<128x128xf32>
    %15 = arith.subf %7, %14 : vector<128x128xf32>
    %16 = math.exp %15 : vector<128x128xf32>
    %17 = arith.truncf %16 : vector<128x128xf32> to vector<128x128xbf16>
    %c0_9 = arith.constant 0 : index
    %c0_10 = arith.constant 0 : index
    %c0_11 = arith.constant 0 : index
    %18 = vector.load %arg5[%c0_9, %c0_10, %c0_11] : memref<1x3x128xbf16, #tpu.memory_space<vmem>>, vector<1x3x128xbf16>
    %19 = vector.shape_cast %18 : vector<1x3x128xbf16> to vector<3x128xbf16>
    %cst_12 = arith.constant dense<0.000000e+00> : vector<3x128xf32>
    %20 = tpu.matmul %19, %17, %cst_12 {dimension_numbers = #tpu.dot_dimension_numbers<[1], [0], [0], [1], [0, 0, 1, 1], [], []>} : vector<3x128xbf16>, vector<128x128xbf16>, vector<3x128xf32> -> vector<3x128xf32>
    %c0_13 = arith.constant 0 : index
    %c0_14 = arith.constant 0 : index
    %21 = vector.load %arg8[%c0_13, %c0_14] : memref<3x128xf32, #tpu.memory_space<vmem>>, vector<3x128xf32>
    %22 = vector.broadcast %13 : vector<1x128xf32> to vector<3x128xf32>
    %23 = arith.mulf %22, %21 : vector<3x128xf32>
    %24 = arith.addf %23, %20 : vector<3x128xf32>
    %c0_15 = arith.constant 0 : index
    %c0_16 = arith.constant 0 : index
    %25 = vector.load %arg8[%c0_15, %c0_16] : memref<3x128xf32, #tpu.memory_space<vmem>>, vector<3x128xf32>
    tpu.vector_store %arg8[%c0_15, %c0_16], %24 {strides = array<i32>} : memref<3x128xf32, #tpu.memory_space<vmem>>, vector<3x128xf32>,
    %c0_17 = arith.constant 0 : index
    %c0_18 = arith.constant 0 : index
    %26 = vector.load %arg7[%c0_17, %c0_18] : memref<1x128xf32, #tpu.memory_space<vmem>>, vector<1x128xf32>
    tpu.vector_store %arg7[%c0_17, %c0_18], %11 {strides = array<i32>} : memref<1x128xf32, #tpu.memory_space<vmem>>, vector<1x128xf32>,
    %c1_i32 = arith.constant 1 : i32
    %27 = arith.cmpi eq, %arg2, %c1_i32 : i32
    %28 = arith.extui %27 : i1 to i32
    %c0_i32_19 = arith.constant 0 : i32
    %29 = arith.cmpi ne, %28, %c0_i32_19 : i32
    scf.if %29 {
      %c0_20 = arith.constant 0 : index
      %c0_21 = arith.constant 0 : index
      %30 = vector.load %arg8[%c0_20, %c0_21] : memref<3x128xf32, #tpu.memory_space<vmem>>, vector<3x128xf32>
      %31 = vector.extract_strided_slice %30 {offsets = [2, 0], sizes = [1, 128], strides = [1, 1]} : vector<3x128xf32> to vector<1x128xf32>
      %32 = tpu.reciprocal %31 {approx = true} : vector<1x128xf32> -> vector<1x128xf32>
      %33 = arith.mulf %31, %32 : vector<1x128xf32>
      %cst_22 = arith.constant 2.000000e+00 : f32
      %34 = vector.broadcast %cst_22 : f32 to vector<1x128xf32>
      %35 = arith.subf %34, %33 : vector<1x128xf32>
      %36 = arith.mulf %32, %35 : vector<1x128xf32>
      %37 = vector.extract_strided_slice %30 {offsets = [0, 0], sizes = [2, 128], strides = [1, 1]} : vector<3x128xf32> to vector<2x128xf32>
      %38 = vector.broadcast %36 : vector<1x128xf32> to vector<2x128xf32>
      %39 = arith.mulf %37, %38 : vector<2x128xf32>
      %c0_23 = arith.constant 0 : index
      %c0_24 = arith.constant 0 : index
      %c0_25 = arith.constant 0 : index
      %40 = vector.load %arg6[%c0_23, %c0_24, %c0_25] : memref<1x2x128xf32, #tpu.memory_space<vmem>>, vector<1x2x128xf32>
      %41 = vector.shape_cast %40 : vector<1x2x128xf32> to vector<2x128xf32>
      %42 = vector.shape_cast %39 : vector<2x128xf32> to vector<1x2x128xf32>
      tpu.vector_store %arg6[%c0_23, %c0_24, %c0_25], %42 {strides = array<i32>} : memref<1x2x128xf32, #tpu.memory_space<vmem>>, vector<1x2x128xf32>,
    } else {
    }
    return
  }
  func.func @transform_0(%arg0: i32, %arg1: i32, %arg2: i32) -> (i32, i32, i32) {
    %c0_i32 = arith.constant 0 : i32
    %c0_i32_0 = arith.constant 0 : i32
    return %arg0, %c0_i32, %arg1 : i32, i32, i32
  }
  func.func @transform_1(%arg0: i32, %arg1: i32, %arg2: i32) -> (i32, i32, i32) {
    %c0_i32 = arith.constant 0 : i32
    %c0_i32_0 = arith.constant 0 : i32
    return %arg0, %c0_i32, %arg2 : i32, i32, i32
  }
  func.func @transform_2(%arg0: i32, %arg1: i32, %arg2: i32) -> (i32, i32, i32) {
    %c0_i32 = arith.constant 0 : i32
    %c0_i32_0 = arith.constant 0 : i32
    return %arg0, %c0_i32, %arg2 : i32, i32, i32
  }
  func.func @transform_3(%arg0: i32, %arg1: i32, %arg2: i32) -> (i32, i32, i32) {
    %c0_i32 = arith.constant 0 : i32
    %c0_i32_0 = arith.constant 0 : i32
    return %arg0, %c0_i32, %arg1 : i32, i32, i32
  }
}

</mosaic_0001>

<bundles_post_ra>
// kernel: tpu_custom_call.1
= control target key start
LH: loop header
LB: loop body
LE: loop exit
PB: predicated region body
PF: predicated region fallthrough
CT: control target
= control target key end

     0   :  { %s1592_s0 = inlined_call_operand.hbm [shape: bf16[2,16,256], index: 0, kind: input, shape index: {}]   ;;  %s1593_s1 = inlined_call_operand.hbm [shape: bf16[2,16,256], index: 1, kind: input, shape index: {}]   ;;  %s1594_s2 = inlined_call_operand.vmem [shape: bf16[2,3,256], index: 2, kind: input, shape index: {}]   ;;  %s1595_s3 = inlined_call_operand.hbm [shape: f32[2,2,256], index: 3, kind: output, shape index: {}]  }
   0x1   :  { %1610 = sst [smem:[#allocation20_spill]] %s1592_s0 }
   0x2   :  { %1611 = sst [smem:[#allocation21_spill]] %s1595_s3 }
   0x3   :  { %8 = vsyncpa [#allocation5], 0 }
   0x4   :  { %10 = vsyncpa [#allocation5 + $0x1], 0 }
   0x5   :  { %11 = vsyncpa [#allocation8], 0 }
   0x6   :  { %13 = vsyncpa [#allocation8 + $0x1], 0 }
   0x7   :  { %14 = vsyncpa [#allocation6], 0 }
   0x8   :  { %16 = vsyncpa [#allocation6 + $0x1], 0  ;;  %s1239_s12 = smov 0   ;;  %s1241_s13 = smov 0  }
   0x9   :  { %s1243_s14 = smov 0   ;;  %s1245_s15 = smov 0  }
   0xa   :  { %s1247_s16 = smov 0   ;;  %s1249_s17 = smov 0  }
   0xb   :  { %s1251_s18 = smov 0   ;;  %s1253_s19 = smov 0  }
   0xc   :  { %s1255_s20 = smov 0   ;;  %s1257_s21 = smov 0  }
   0xd   :  { %s1259_s22 = smov 0   ;;  %s1261_s23 = smov 0  }
   0xe   :  { %s1263_s24 = smov 0  }
   0xf LB: > { %1612 = sst [smem:[#allocation13_spill]] %s1171_s15  ;;  %s753_s25 = sadd.s32 4294967295, %s1207_s24   ;;  %s1207_s24 = sphi %s1263_s24, %s22_s24   ;;  %s1203_s23 = sphi %s1261_s23, %s1657_s23   ;;  %s1199_s22 = sphi %s1259_s22, %s1648_s22   ;;  %s1195_s21 = sphi %s1257_s21, %s1647_s21   ;;  %s1191_s20 = sphi %s1255_s20, %s1656_s20   ;;  %s1187_s19 = sphi %s1253_s19, %s1646_s19   ;;  %s1183_s18 = sphi %s1251_s18, %s1645_s18   ;;  %s1179_s17 = sphi %s1249_s17, %s1655_s17   ;;  %s1175_s16 = sphi %s1247_s16, %s1654_s16   ;;  %s1171_s15 = sphi %s1245_s15, %s1653_s15   ;;  %s1167_s14 = sphi %s1243_s14, %s1652_s14   ;;  %s1163_s13 = sphi %s1241_s13, %s1651_s13   ;;  %s1159_s12 = sphi %s1239_s12, %s1650_s12  }
  0x10   : > { %1613 = sst [smem:[#allocation14_spill]] %s1195_s21  ;;  %s754_s26 = sadd.s32 4294967294, %s1207_s24  }
  0x11   : > { %1614 = sst [smem:[#allocation15_spill]] %s1199_s22  ;;  %p57_p0 = scmp.ne.s32.totalorder %s1179_s17, %s1175_s16 }
  0x12   : > { %p1601_p1 = scmp.eq.s32.totalorder %s1207_s24, 0  ;;  %p63_p2 = scmp.ne.s32.totalorder %s1175_s16, %s1171_s15 }
  0x13   : > { %p1313_p3 = scmp.eq.s32.totalorder %s753_s25, 0  ;;  %p145_p4 = scmp.eq.s32.totalorder %s753_s25, 7 }
  0x14   : > { %p1319_p5 = por %p1601_p1, %p57_p0  ;;  %p151_p6 = scmp.eq.s32.totalorder %s754_s26, 7 }
  0x15   : > { %p1325_p7 = por %p1313_p3, %p63_p2  ;;  %p1329_p8 = por %p145_p4, %p57_p0 }
  0x16   : > { %p1333_p9 = por %p151_p6, %p63_p2  ;;  %p859_p10 = scmp.lt.s32.totalorder %s1207_s24, 8 }
  0x17   : > { %s1618_s5 = scalar_select %p1329_p8, 1, 0 }
  0x18   : > { %s1620_s6 = scalar_select %p1333_p9, 1, 0 }
  0x19   : > { %1619 = sst [smem:[#allocation16_spill]] %s1618_s5  ;;  %s171_s7 = sand.u32 1, %s1179_s17  }
  0x1a   : > { %1621 = sst [smem:[#allocation17_spill]] %s1620_s6  ;;  %s757_s8 = sshll.u32 %s171_s7, 3 }
  0x1b   : > { %s758_s9 = sshll.u32 %s1203_s23, 2  ;;  %s175_s11 = scalar_lea.vmem [#allocation4], %s757_s8 }
  0x1c   : > { %s180_s10 = sadd.s32 %s1199_s22, %s758_s9  ;;  %s183_s25 = sshll.u32 %s175_s11, 4  ;;  %s184_s25 = int_to_ptr.vmem [resolvable:$true] %s183_s25 }
  0x1d   : > { %s759_s26 = sshll.u32 %s180_s10, 6  ;;  %s1622_s0 = sld [smem:[#allocation20_spill]] }
  0x1e   : > { %p1350_p11 = pnand %p859_p10, %p1319_p5  ;;  %s172_s6 = scalar_lea.sflag [#allocation5], %s171_s7 }
  0x1f   : > { %s1024_s5 = scalar_lea.vmem %s184_s25, 128  ;;  %s1209_s8 = smov [#allocation4]  }
  0x20   : > { %p1013_p12 = pneg %p1350_p11  ;;  %p1025_p13 = scmp.ne.s32.totalorder %s184_s25, %s1024_s5 }
  0x21   : > { %s1029_s10 = sshll.u32 %s1209_s8, 4  ;;  %s1030_s10 = int_to_ptr.vmem [resolvable:$false] %s1029_s10 }
  0x22   : > { %p1027_p0 = pnand %p1025_p13, %p1013_p12  ;;  %s1031_s11 = scalar_lea.vmem %s1030_s10, 256 }
  0x23   : > { %s182_s15 = scalar_lea.hbm %s1622_s0, %s759_s26  ;;  %p1032_p4 = scmp.lt.s32.totalorder %s184_s25, %s1030_s10 }
  0x24   : > { %p1028_p2 = pneg %p1027_p0  ;;  %p1033_p6 = scmp.lt.s32.totalorder %s1031_s11, %s1024_s5 }
  0x26   : > { %p1034_p1 = por %p1033_p6, %p1032_p4 }
  0x28   : > { %p1035_p9 = pnand %p1034_p1, %p1028_p2 }
  0x2a   : > { %1038 = shalt.err (!%p1035_p9)
}
  0x2b   : > { %s1602_s27 = smov 128   ;;  %s1603_s28 = smov 64  }
  0x2c   : > { %s1604_s30 = smov 4   ;;  %p763_p1 = scmp.ge.s32.totalorder %s1207_s24, 1 }
  0x2d   : > { %851 = dma.hbm_to_vmem [thread:$0]  (!%p1350_p11), %s182_s15, 128, %s184_s25, %s172_s6, %s1602_s27, %s1603_s28, %s1604_s30  }
  0x2e   : > { %p224_p5 = scmp.lt.s32.totalorder %s1207_s24, 9  ;;  %s34_s26 = sadd.s32 1, %s1195_s21 }
  0x2f   : > { %p35_p12 = scmp.ge.s32.totalorder %s34_s26, 2  ;;  %p91_p13 = scmp.ne.s32.totalorder %s1163_s13, %s1159_s12 }
  0x30   : > { %p1364_p9 = pnand %p763_p1, %p224_p5  ;;  %s1626_s15 = sadd.s32 1, %s1199_s22 }
  0x31   : > { %s1659_s26 = smov (%p35_p12, %s34_s26), 0  ;;  %s1661_s15 = smov (!%p35_p12, %s1626_s15), %s1199_s22 }
  0x32   : > { %1625 = sst [smem:[#allocation18_spill]] %s1659_s26  ;;  %s74_s6 = ssub.s32 %s1195_s21, %s1659_s26 }
  0x33   : > { %p85_p11 = scmp.ne.s32.totalorder %s1167_s14, %s1163_s13  ;;  %p39_p0 = scmp.ge.s32.totalorder %s1661_s15, 2 }
  0x34   : > { %p1383_p2 = por %p91_p13, %p1313_p3  ;;  %s193_s8 = sand.u32 1, %s1167_s14  }
  0x35   : > { %s202_s10 = sadd.s32 %s1195_s21, %s758_s9  ;;  %s1663_s15 = smov (%p39_p0, %s1661_s15), 0 }
  0x36   : > { %1628 = sst [smem:[#allocation19_spill]] %s1663_s15  ;;  %s1629_s12 = sadd.s32 1, %s1203_s23 }
  0x37   : > { %s1665_s12 = smov (!%p39_p0, %s1629_s12), %s1203_s23  ;;  %s46_s11 = ssub.s32 %s1199_s22, %s1663_s15 }
  0x38   : > { %p1630_p4 = scmp.eq.s32.totalorder %s1207_s24, 0  ;;  %p43_p3 = scmp.ge.s32.totalorder %s1665_s12, 2 }
  0x39   : > { %s760_s29 = sshll.u32 %s193_s8, 3  ;;  %s762_s9 = sshll.u32 %s202_s10, 6 }
  0x3a   : > { %p1400_p6 = por %p85_p11, %p1630_p4  ;;  %s1667_s12 = smov (%p43_p3, %s1665_s12), 0 }
  0x3b   : > { %s1409_s3 = scalar_lea.hbm %s1593_s1, %s762_s9  ;;  %s45_s5 = ssub.s32 %s1203_s23, %s1667_s12 }
  0x3c   : > { %s197_s0 = scalar_lea.vmem [#allocation7], %s760_s29  ;;  %s47_s26 = sor.u32 %s46_s11, %s45_s5 }
  0x3d   : > { %s205_s15 = sshll.u32 %s197_s0, 4  ;;  %s75_s22 = sor.u32 %s74_s6, %s45_s5  ;;  %s206_s15 = int_to_ptr.vmem [resolvable:$true] %s205_s15 }
  0x3e   : > { %p48_p1 = scmp.eq.s32.totalorder %s47_s26, 0  ;;  %p76_p5 = scmp.eq.s32.totalorder %s75_s22, 0 }
  0x3f   : > { %p1417_p12 = pnand %p859_p10, %p1400_p6  ;;  %s1633_s21 = sadd.s32 1, %s1179_s17 }
  0x40   : > { %s1424_s28 = scalar_select %p48_p1, %s1179_s17, %s1633_s21  }
  0x41   : > { %s1634_s30 = sadd.s32 1, %s1167_s14  ;;  %s194_s29 = scalar_lea.sflag [#allocation8], %s193_s8 }
  0x42   : > { %s1429_s9 = scalar_select %p76_p5, %s1167_s14, %s1634_s30  }
  0x43   : > { %p1041_p13 = pneg %p1417_p12  ;;  %s1052_s0 = scalar_lea.vmem %s206_s15, 128 }
  0x44   : > { %p1053_p11 = scmp.ne.s32.totalorder %s206_s15, %s1052_s0  ;;  %s1213_s22 = smov [#allocation7]  }
  0x45   : > { %s1057_s27 = sshll.u32 %s1213_s22, 4  ;;  %s1058_s27 = int_to_ptr.vmem [resolvable:$false] %s1057_s27 }
  0x46   : > { %p1055_p0 = pnand %p1053_p11, %p1041_p13  ;;  %s1059_s5 = scalar_lea.vmem %s1058_s27, 256 }
  0x47   : > { %p1060_p10 = scmp.lt.s32.totalorder %s206_s15, %s1058_s27  ;;  %p1061_p6 = scmp.lt.s32.totalorder %s1059_s5, %s1052_s0 }
  0x48   : > { %p1056_p4 = pneg %p1055_p0 }
  0x49   : > { %p1062_p3 = por %p1061_p6, %p1060_p10 }
  0x4b   : > { %p1063_p8 = pnand %p1062_p3, %p1056_p4 }
  0x4d   : > { %1066 = shalt.err (!%p1063_p8)
}
  0x4e   : > { %s1635_s21 = smov 4   ;;  %s1636_s26 = smov 64  }
  0x4f   : > { %s1637_s6 = smov 128   ;;  %228 = sbr.rel (%p1364_p9) target bundleno = 757 (0x2f5), region = 32 }
  0x50   : > { %854 = dma.hbm_to_vmem [thread:$0]  (!%p1417_p12), %s1409_s3, 128, %s206_s15, %s194_s29, %s1637_s6, %s1636_s26, %s1635_s21  }
  0x51   : > { %s1442_s8 = sand.u32 (!%p1364_p9), 1, %s1175_s16  }
  0x52   : > { %s764_s11 = sshll.u32 (!%p1364_p9), %s1442_s8, 3  ;;  %s231_s30 = scalar_lea.sflag (!%p1364_p9), [#allocation5], %s1442_s8 }
  0x53   : > { %s234_s0 = scalar_lea.vmem (!%p1364_p9), [#allocation4], %s764_s11 }
  0x54   : > { %1146 = dma.done.wait (%p1325_p7), %s231_s30, 128  }
  0x55   : > { %1148 = vsyncadd (%p1325_p7), %s231_s30, 4294967168  ;;  %s239_s3 = sand.u32 1, %s1163_s13  }
  0x56   : > { %s765_s15 = sshll.u32 %s239_s3, 3  ;;  %s240_s7 = scalar_lea.sflag [#allocation8], %s239_s3 }
  0x57   : > { %s243_s10 = scalar_lea.vmem [#allocation7], %s765_s15 }
  0x58   : > { %1150 = dma.done.wait (%p1383_p2), %s240_s7, 128  }
  0x59   : > { %1152 = vsyncadd (%p1383_p2), %s240_s7, 4294967168  ;;  %s766_s29 = sshll.u32 %s1442_s8, 1  ;;  %p279_p8 = scmp.lt.s32.totalorder %s1191_s20, 1 }
  0x5a   : > { %p281_p9 = scmp.lt.s32.totalorder %s1183_s18, 1  ;;  %s1465_s25 = scalar_lea.vmem [#allocation9], %s766_s29 }
  0x5b   : > { %s280_s4 = scalar_select %p279_p8, %s1191_s20, 1 }
  0x5c   : > { %s282_s22 = scalar_select %p281_p9, %s1183_s18, 1 }
  0x5d   : > { %s767_s27 = sshll.u32 %s280_s4, 1  ;;  %p769_p7 = scmp.ne.s32.totalorder %s1183_s18, 0 }
  0x5e   : > { %s284_s5 = sadd.s32 %s767_s27, %s282_s22 }
  0x5f   : > { %s768_s21 = sshll.u32 %s284_s5, 1  ;;  %291 = sbr.rel (%p769_p7) target bundleno = 102 (0x66), region = 44 }
  0x60   : > { %s1463_s11 = scalar_lea.vmem %s1594_s2, %s768_s21 }
  0x64   : > { %v1214_v0 = vmov -inf   ;;  %v1215_v1 = vmov 0.0  }
  0x65   : > { %292 = vst [vmem:[#allocation2] sm:$0x1] %v1214_v0  ;;  %293 = vst [vmem:[#allocation3] sm:$0x7] %v1215_v1 }
  0x66 PF: > { %v973_v2 = vld [vmem:[%s243_s10] sm:$0xff]   ;;  %v974_v3 = vld [vmem:[%s234_s0] sm:$0xff]   ;;  %vm326_vm0 = vcmask 130048   ;;  %v1216_v12 = vmov 0.0   ;;  %vm1217_vm1 = vmmov 0   ;;  %v475_v46 = vlaneseq  ;;  %p780_p2 = scmp.ne.s32.totalorder %s1183_s18, 1 }
  0x67   : > { %304 = vxpose.xlu0.c.b16.start.end [1/1] (short) %v973_v2, 128  ;;  %804 = vmatprep.subr.bf16.mxu0 %v974_v3 }
  0x68   : > { %805 = vmatpush3.bf16.msra.mxu0 %v974_v3  ;;  %822 = vmatprep.subr.bf16.mxu1 %v1216_v12  ;;  %v1502_v49 = vshrl.u32 %v475_v46, 7 }
  0x69   : > { %838 = vmatprep.mubr.msk.bf16.mxu1 %vm1217_vm1, %v1216_v12 }
  0x6a   : > { %v477_v53 = vsub.s32 0, %v1502_v49 }
  0x6c   : > { %v448_v51 = vld [vmem:[#allocation2] sm:$0x1] }
  0xc9   : > { %v312_v4 = vpop.trf.xlu0 }
  0xca   : > { %806 = vmatprep.mubr.msk.bf16.mxu0 %vm326_vm0, %v312_v4 }
  0xcd   : > { %v313_v5 = vpop.trf.xlu0 }
  0xce   : > { %807 = vmatmul.mubr.msk.bf16.vlgmr.msra.gmra.mxu0 %vm326_vm0, %v313_v5 }
  0xd1   : > { %v314_v6 = vpop.trf.xlu0 }
  0xd2   : > { %810 = vmatprep.mubr.msk.bf16.mxu0 %vm326_vm0, %v314_v6 }
  0xd5   : > { %v315_v7 = vpop.trf.xlu0 }
  0xd6   : > { %811 = vmatmul.mubr.msk.bf16.gmra.mxu0 %vm326_vm0, %v315_v7 }
  0xd9   : > { %v316_v8 = vpop.trf.xlu0 }
  0xda   : > { %814 = vmatprep.mubr.msk.bf16.mxu0 %vm326_vm0, %v316_v8 }
  0xdd   : > { %v317_v9 = vpop.trf.xlu0 }
  0xde   : > { %815 = vmatmul.mubr.msk.bf16.gmra.mxu0 %vm326_vm0, %v317_v9 }
  0xe1   : > { %v318_v10 = vpop.trf.xlu0 }
  0xe2   : > { %818 = vmatprep.mubr.msk.bf16.mxu0 %vm326_vm0, %v318_v10 }
  0xe5   : > { %v319_v11 = vpop.trf.xlu0 }
  0xe6   : > { %819 = vmatmul.mubr.msk.bf16.gmra.mxu0 %vm326_vm0, %v319_v11 }
 0x18e   : > { %v1478_v13 = vpop.f32.mrf.mxu0 }
 0x190   : > { %v1480_v14 = vpop.f32.mrf.mxu0 }
 0x192   : > { %v1482_v15 = vpop.f32.mrf.mxu0 }
 0x194   : > { %v1484_v16 = vpop.f32.mrf.mxu0 }
 0x196   : > { %v1486_v17 = vpop.f32.mrf.mxu0 }
 0x197   : > { %v451_v28 = vmax.f32 %v1478_v13, %v1486_v17 }
 0x198   : > { %v1488_v18 = vpop.f32.mrf.mxu0 }
 0x199   : > { %v449_v29 = vmax.f32 %v1480_v14, %v1488_v18 }
 0x19a   : > { %v1490_v19 = vpop.f32.mrf.mxu0 }
 0x19b   : > { %v452_v26 = vmax.f32 %v1482_v15, %v1490_v19 }
 0x19c   : > { %v1492_v20 = vpop.f32.mrf.mxu0 }
 0x19d   : > { %v450_v30 = vmax.f32 %v1484_v16, %v1492_v20 }
 0x19e   : > { %v816_v21 = vpop.f32.mrf.mxu0 }
 0x19f   : > { %v455_v33 = vmax.f32 %v451_v28, %v816_v21 }
 0x1a0   : > { %v417_v22 = vpop.f32.mrf.mxu0 }
 0x1a1   : > { %v453_v34 = vmax.f32 %v449_v29, %v417_v22 }
 0x1a2   : > { %v817_v23 = vpop.f32.mrf.mxu0 }
 0x1a3   : > { %v456_v31 = vmax.f32 %v452_v26, %v817_v23 }
 0x1a4   : > { %v420_v24 = vpop.f32.mrf.mxu0 }
 0x1a5   : > { %v454_v35 = vmax.f32 %v450_v30, %v420_v24 }
 0x1a6   : > { %v820_v25 = vpop.f32.mrf.mxu0 }
 0x1a7   : > { %v459_v38 = vmax.f32 %v455_v33, %v820_v25 }
 0x1a8   : > { %v433_v27 = vpop.f32.mrf.mxu0 }
 0x1a9   : > { %v457_v39 = vmax.f32 %v453_v34, %v433_v27 }
 0x1aa   : > { %v821_v32 = vpop.f32.mrf.mxu0 }
 0x1ab   : > { %v460_v36 = vmax.f32 %v456_v31, %v821_v32 }
 0x1ac   : > { %v436_v37 = vpop.f32.mrf.mxu0 }
 0x1ad   : > { %v458_v40 = vmax.f32 %v454_v35, %v436_v37  ;;  %v462_v41 = vmax.f32 %v459_v38, %v460_v36 }
 0x1af   : > { %v461_v42 = vmax.f32 %v457_v39, %v458_v40 }
 0x1b1   : > { %v463_v43 = vmax.f32 %v461_v42, %v462_v41 }
 0x1b3   : > { %v464_v44 = vrot.slane %v463_v43, 4 }
 0x1b5   : > { %v465_v45 = vmax.f32 %v463_v43, %v464_v44 }
 0x1b7   : > { %v466_v47 = vrot.slane %v465_v45, 2 }
 0x1b9   : > { %v467_v48 = vmax.f32 %v465_v45, %v466_v47 }
 0x1bb   : > { %v468_v50 = vrot.slane %v467_v48, 1 }
 0x1bd   : > { %v469_v52 = vmax.f32 %v467_v48, %v468_v50 }
 0x1bf   : > { %v470_v54 = vmax.f32 %v448_v51, %v469_v52 }
 0x1c1   : > { %v471_v55 = vsub.f32 %v448_v51, %v470_v54  ;;  %v478_v56 = vrot.slane %v470_v54, %v477_v53  ;;  %587 = vst [vmem:[#allocation2] sm:$0x1] %v470_v54  ;;  %v536_v54 = vld [vmem:[%s1463_s11] sm:$0x3] }
 0x1c3   : > { %v472_v57 = vmul.f32 1.442695, %v471_v55  ;;  %v493_v58 = vsub.f32 %v436_v37, %v478_v56  ;;  %v494_v59 = vsub.f32 %v820_v25, %v478_v56  ;;  %v495_v60 = vsub.f32 %v821_v32, %v478_v56  ;;  %v577_v55 = vld [vmem:[#allocation3] sm:$0x7] }
 0x1c4   : > { %v492_v61 = vsub.f32 %v433_v27, %v478_v56  ;;  %v490_v1 = vsub.f32 %v816_v21, %v478_v56  ;;  %v491_v3 = vsub.f32 %v817_v23, %v478_v56  ;;  %v488_v4 = vsub.f32 %v417_v22, %v478_v56 }
 0x1c5   : > { %975 = vpow2.f32 %v472_v57  ;;  %v524_v62 = vmul.f32 1.442695, %v494_v59  ;;  %v526_v63 = vmul.f32 1.442695, %v495_v60  ;;  %v522_v0 = vmul.f32 1.442695, %v493_v58 }
 0x1c6   : > { %v520_v2 = vmul.f32 1.442695, %v492_v61  ;;  %v489_v5 = vsub.f32 %v420_v24, %v478_v56  ;;  %v516_v6 = vmul.f32 1.442695, %v490_v1  ;;  %v486_v7 = vsub.f32 %v1486_v17, %v478_v56 }
 0x1c7   : > { %977 = vpow2.f32 %v524_v62  ;;  %v518_v8 = vmul.f32 1.442695, %v491_v3  ;;  %v482_v9 = vsub.f32 %v1478_v13, %v478_v56  ;;  %v512_v10 = vmul.f32 1.442695, %v488_v4 }
 0x1c8   : > { %979 = vpow2.f32 %v526_v63  ;;  %v483_v11 = vsub.f32 %v1482_v15, %v478_v56  ;;  %v514_v25 = vmul.f32 1.442695, %v489_v5  ;;  %v480_v21 = vsub.f32 %v1480_v14, %v478_v56 }
 0x1c9   : > { %981 = vpow2.f32 %v522_v0  ;;  %v508_v23 = vmul.f32 1.442695, %v486_v7  ;;  %v481_v22 = vsub.f32 %v1484_v16, %v478_v56  ;;  %v487_v24 = vsub.f32 %v1490_v19, %v478_v56 }
 0x1ca   : > { %983 = vpow2.f32 %v520_v2  ;;  %v500_v26 = vmul.f32 1.442695, %v482_v9  ;;  %v502_v17 = vmul.f32 1.442695, %v483_v11  ;;  %v496_v27 = vmul.f32 1.442695, %v480_v21 }
 0x1cb   : > { %985 = vpow2.f32 %v516_v6  ;;  %v484_v13 = vsub.f32 %v1488_v18, %v478_v56  ;;  %v498_v15 = vmul.f32 1.442695, %v481_v22  ;;  %v510_v29 = vmul.f32 1.442695, %v487_v24 }
 0x1cc   : > { %987 = vpow2.f32 %v518_v8  ;;  %v485_v14 = vsub.f32 %v1492_v20, %v478_v56 }
 0x1cd   : > { %989 = vpow2.f32 %v512_v10  ;;  %v504_v19 = vmul.f32 1.442695, %v484_v13 }
 0x1ce   : > { %991 = vpow2.f32 %v514_v25  ;;  %v506_v34 = vmul.f32 1.442695, %v485_v14 }
 0x1cf   : > { %993 = vpow2.f32 %v508_v23 }
 0x1d0   : > { %995 = vpow2.f32 %v500_v26 }
 0x1d1   : > { %997 = vpow2.f32 %v502_v17 }
 0x1d2   : > { %v976_v28 = vpop.eup %975  ;;  %999 = vpow2.f32 %v496_v27 }
 0x1d3   : > { %v582_v30 = vrot.slane %v976_v28, %v477_v53  ;;  %1001 = vpow2.f32 %v498_v15 }
 0x1d4   : > { %v978_v16 = vpop.eup %977  ;;  %1003 = vpow2.f32 %v510_v29 }
 0x1d5   : > { %v980_v31 = vpop.eup %979  ;;  %1005 = vpow2.f32 %v504_v19  ;;  %v584_v56 = vmul.f32 %v582_v30, %v577_v55 }
 0x1d6   : > { %v982_v32 = vpop.eup %981  ;;  %v535_v33 = vpack.c.bf16 %v980_v31, %v978_v16  ;;  %1007 = vpow2.f32 %v506_v34 }
 0x1d7   : > { %v984_v35 = vpop.eup %983 }
 0x1d8   : > { %823 = vmatpush3.bf16.msra.mxu1 %v535_v33  ;;  %v986_v18 = vpop.eup %985  ;;  %v534_v36 = vpack.c.bf16 %v982_v32, %v984_v35 }
 0x1d9   : > { %824 = vmatprep.subr.bf16.mxu1 %v1216_v12  ;;  %v988_v20 = vpop.eup %987 }
 0x1da   : > { %v990_v37 = vpop.eup %989  ;;  %v533_v40 = vpack.c.bf16 %v988_v20, %v986_v18 }
 0x1db   : > { %v992_v38 = vpop.eup %991 }
 0x1dc   : > { %825 = vmatpush3.bf16.msra.mxu1 %v534_v36  ;;  %v994_v39 = vpop.eup %993  ;;  %v532_v46 = vpack.c.bf16 %v992_v38, %v990_v37 }
 0x1dd   : > { %826 = vmatprep.subr.bf16.mxu1 %v1216_v12  ;;  %v996_v41 = vpop.eup %995 }
 0x1de   : > { %v998_v42 = vpop.eup %997 }
 0x1df   : > { %v1000_v43 = vpop.eup %999  ;;  %v529_v44 = vpack.c.bf16 %v998_v42, %v996_v41 }
 0x1e0   : > { %827 = vmatpush3.bf16.msra.mxu1 %v533_v40  ;;  %v1002_v45 = vpop.eup %1001 }
 0x1e1   : > { %828 = vmatprep.subr.bf16.mxu1 %v1216_v12  ;;  %v1004_v47 = vpop.eup %1003  ;;  %v528_v48 = vpack.c.bf16 %v1002_v45, %v1000_v43 }
 0x1e2   : > { %v1006_v50 = vpop.eup %1005  ;;  %v531_v51 = vpack.c.bf16 %v1004_v47, %v994_v39 }
 0x1e3   : > { %v1008_v52 = vpop.eup %1007 }
 0x1e4   : > { %829 = vmatpush3.bf16.msra.mxu1 %v532_v46  ;;  %v530_v53 = vpack.c.bf16 %v1008_v52, %v1006_v50 }
 0x1e5   : > { %830 = vmatprep.subr.bf16.mxu1 %v1216_v12 }
 0x1e8   : > { %831 = vmatpush3.bf16.msra.mxu1 %v531_v51 }
 0x1e9   : > { %832 = vmatprep.subr.bf16.mxu1 %v1216_v12 }
 0x1ec   : > { %833 = vmatpush3.bf16.msra.mxu1 %v530_v53 }
 0x1ed   : > { %834 = vmatprep.subr.bf16.mxu1 %v1216_v12 }
 0x1f0   : > { %835 = vmatpush3.bf16.msra.mxu1 %v529_v44 }
 0x1f1   : > { %836 = vmatprep.subr.bf16.mxu1 %v1216_v12 }
 0x1f4   : > { %837 = vmatpush3.bf16.msra.mxu1 %v528_v48 }
 0x1f7   : > { %839 = vmatmul.mubr.bf16.vlgmr.msra.gmra.mxu1 %v536_v54 }
 0x2b7   : > { %v571_v57 = vpop.f32.mrf.mxu1 }
 0x2b8   : > { %v585_v58 = vadd.f32 %v584_v56, %v571_v57 }
 0x2b9   : > { %v840_v59 = vpop.f32.mrf.mxu1  ;;  %591 = sbr.rel (%p780_p2) target bundleno = 731 (0x2db), region = 48 }
 0x2ba   : > { %586 = vst [vmem:[#allocation3] sm:$0x7] %v585_v58 }
 0x2bb   : > { %v574_v60 = vpop.f32.mrf.mxu1 }
 0x2bd   : > { %v841_v61 = vpop.f32.mrf.mxu1 }
 0x2be   : > { %v599_v1 = vsub.s32 2, %v1502_v49 }
 0x2c1   : > { %v592_v62 = vld [vmem:[#allocation3] sm:$0x7] }
 0x2c2   : > { %1009 = vrcp.f32 %v592_v62 }
 0x2cf   : > { %v1010_v63 = vpop.eup %1009 }
 0x2d0   : > { %v594_v0 = vmul.f32 %v1010_v63, %v592_v62 }
 0x2d2   : > { %v595_v12 = vsub.f32 2.0, %v594_v0 }
 0x2d4   : > { %v596_v2 = vmul.f32 %v1010_v63, %v595_v12 }
 0x2d6   : > { %v600_v3 = vrot.slane %v596_v2, %v599_v1 }
 0x2d8   : > { %v601_v4 = vmul.f32 %v600_v3, %v592_v62 }
 0x2da   : > { %602 = vst [vmem:[%s1465_s25] sm:$0x3] %v601_v4 }
 0x2db PF: > { %s1638_s30 = sld [smem:[#allocation16_spill]]  ;;  %s782_s18 = sshll.u32 %s1191_s20, 1 }
 0x2dc   : > { %s615_s0 = sadd.s32 %s1187_s19, %s782_s18  ;;  %s619_s3 = sshll.u32 %s1465_s25, 4  ;;  %s620_s3 = int_to_ptr.vmem [resolvable:$true] %s619_s3 }
 0x2dd   : > { %s783_s15 = sshll.u32 %s615_s0, 5  ;;  %s1639_s29 = sld [smem:[#allocation21_spill]] }
 0x2de   : > { %s604_s22 = scalar_lea.sflag [#allocation6], %s1442_s8  ;;  %s1067_s27 = scalar_lea.vmem %s620_s3, 32 }
 0x2df   : > { %p1068_p1 = scmp.ne.s32.totalorder %s620_s3, %s1067_s27  ;;  %s1218_s5 = smov [#allocation9]  }
 0x2e0   : > { %s1071_s21 = sshll.u32 %s1218_s5, 4  ;;  %s1072_s21 = int_to_ptr.vmem [resolvable:$false] %s1071_s21 }
 0x2e1   : > { %p1640_p5 = scmp.ne.s32.totalorder %s1638_s30, 0  ;;  %s1073_s26 = scalar_lea.vmem %s1072_s21, 64 }
 0x2e2   : > { %p1074_p11 = scmp.lt.s32.totalorder %s620_s3, %s1072_s21  ;;  %p1075_p0 = scmp.lt.s32.totalorder %s1073_s26, %s1067_s27 }
 0x2e3   : > { %s617_s4 = scalar_lea.hbm %s1639_s29, %s783_s15  ;;  %p1069_p12 = pnand %p1068_p1, %p1640_p5 }
 0x2e4   : > { %p1076_p4 = por %p1075_p0, %p1074_p11 }
 0x2e5   : > { %p1070_p13 = pneg %p1069_p12 }
 0x2e7   : > { %p1077_p10 = pnand %p1076_p4, %p1070_p13 }
 0x2e9   : > { %1080 = shalt.err (!%p1077_p10)
}
 0x2ea   : > { %s1081_s19 = scalar_lea.hbm %s617_s4, 32  ;;  %s1085_s6 = scalar_lea.hbm %s1639_s29, 128 }
 0x2eb   : > { %p1082_p6 = scmp.ne.s32.totalorder %s617_s4, %s1081_s19  ;;  %p1086_p9 = scmp.lt.s32.totalorder %s617_s4, %s1639_s29 }
 0x2ec   : > { %p1087_p7 = scmp.lt.s32.totalorder %s1085_s6, %s1081_s19 }
 0x2ed   : > { %p1083_p3 = pnand %p1082_p6, %p1640_p5 }
 0x2ee   : > { %p1088_p2 = por %p1087_p7, %p1086_p9 }
 0x2ef   : > { %p1084_p8 = pneg %p1083_p3 }
 0x2f1   : > { %p1089_p1 = pnand %p1088_p2, %p1084_p8 }
 0x2f3   : > { %1092 = shalt.err (!%p1089_p1)
}
 0x2f4   : > { %846 = dma.vmem_to_hbm [thread:$0]  (%p1640_p5), %s620_s3, 32, %s617_s4, %s604_s22  }
 0x2f5 PF: > { %s1641_s18 = sld [smem:[#allocation13_spill]]  ;;  %p860_p12 = scmp.ge.s32.totalorder %s1207_s24, 2 }
 0x2f6   : > { %s1642_s0 = sld [smem:[#allocation17_spill]] }
 0x2fb   : > { %s631_s15 = sand.u32 1, %s1641_s18  }
 0x2fc   : > { %p1643_p13 = scmp.ne.s32.totalorder %s1642_s0, 0  ;;  %s632_s7 = scalar_lea.sflag [#allocation6], %s631_s15 }
 0x2fe   : > { %p856_p11 = pnand %p860_p12, %p1643_p13 }
 0x300   : > { %p857_p0 = pneg %p856_p11 }
 0x302   : > { %1154 = dma.done.wait (%p857_p0), %s632_s7, 32  }
 0x303   : > { %1156 = vsyncadd (%p857_p0), %s632_s7, 4294967264  ;;  %s22_s24 = sadd.s32 1, %s1207_s24   ;;  %s1645_s18 = sld [smem:[#allocation14_spill]] }
 0x304   : > { %p1548_p4 = scmp.ge.s32.totalorder %s22_s24, 10   ;;  %s1646_s19 = sld [smem:[#allocation15_spill]] }
 0x305   : > { %s1647_s21 = sld [smem:[#allocation18_spill]]  ;;  %s1649_s30 = smov %s1667_s12 }
 0x306   : > { %s1648_s22 = sld [smem:[#allocation19_spill]]  ;;  %s1650_s12 = smov %s1163_s13 }
 0x307   : > { %s1651_s13 = smov %s1167_s14  ;;  %s1652_s14 = smov %s1429_s9 }
 0x308   : > { %s1653_s15 = smov %s1175_s16  ;;  %s1654_s16 = smov %s1179_s17 }
 0x309   : > { %s1655_s17 = smov %s1424_s28  ;;  %s1656_s20 = smov %s1203_s23 }
 0x30a   : > { %s1657_s23 = smov %s1649_s30  ;;  %21 = sbr.rel (!%p1548_p4) target bundleno = 15 (0xf), region = 101 }
 0x30f   :  { %637 = vsyncpa [#allocation5], 1 }
 0x310   :  { %639 = vsyncpa [#allocation5 + $0x1], 1 }
 0x311   :  { %640 = vsyncpa [#allocation8], 1 }
 0x312   :  { %642 = vsyncpa [#allocation8 + $0x1], 1 }
 0x313   :  { %643 = vsyncpa [#allocation6], 1 }
 0x314   :  { %645 = vsyncpa [#allocation6 + $0x1], 1 }

</bundles_post_ra>
